<compile_context>
chip_gen: v5e
topology: v5e:2x2
jax: 0.10.0
libtpu: 0.0.40
codegen_flags: <defaults>
</compile_context>

<pallas_src>
import functools

import jax
import jax.numpy as jnp
from jax import lax
from jax.experimental import pallas as pl
from jax.experimental.pallas import tpu as pltpu


_LANE_CHUNK = 1024                        # lanes per inner-loop chunk (hidden stays in vregs)
_MAX_LANES_PER_STEP = 32 * _LANE_CHUNK    # 32768 lanes per grid step


def _round_up(x: int, m: int) -> int:
    return ((x + m - 1) // m) * m


def _default_hidden_dtype():
    """bf16 hidden compute on v6e/v7x (bf16 VALUs, packed vregs); f32 on v5e/older."""
    try:
        kind = jax.devices()[0].device_kind.lower()
    except Exception:
        return jnp.float32
    if ("v6" in kind) or ("6e" in kind) or ("v7" in kind) or ("7x" in kind):
        return jnp.bfloat16
    return jnp.float32


def _vmem_budget_bytes() -> int:
    """Conservative per-step VMEM budget that fits every generation's *default*
    scoped-VMEM limit (v5e: 16 MiB, v6e/v7x: 32 MiB) without raising
    vmem_limit_bytes."""
    try:
        cap = int(pltpu.get_tpu_info().vmem_capacity_bytes)   # physical VMEM
    except Exception:
        cap = 64 << 20
    return min(cap // 8, 8 << 20)


def _pick_batch_tile(B: int) -> tuple[int, int]:
    """Return (tb, lane_chunk): lanes per grid step and per inner-loop chunk."""
    if B <= _LANE_CHUNK:
        tb = _round_up(max(B, 1), 128)              # one clean block = one chunk
        return tb, tb
    # Per-lane VMEM bytes: double-buffered f32 x and out tiles.  Weights and the
    # per-chunk hidden activations are negligible / live in vregs.
    per_lane = (4 + 4) * 2
    budget_lanes = max(_LANE_CHUNK, _vmem_budget_bytes() // per_lane)
    tb = min(_MAX_LANES_PER_STEP, (budget_lanes // _LANE_CHUNK) * _LANE_CHUNK)
    if B <= tb:
        tb = _round_up(B, _LANE_CHUNK)              # single (possibly ragged) block
    return tb, _LANE_CHUNK


def _value_net_kernel(x_ref, w1_ref, b1_ref, w2_ref, b2_ref, o_ref, *,
                      lane_chunk, n_chunks, hidden_dtype):
    # Resident weights: load + cast once per grid step (hoisted out of the loop).
    w1 = w1_ref[...].astype(hidden_dtype)     # (H, 1)
    b1 = b1_ref[...].astype(hidden_dtype)     # (H, 1)
    w2 = w2_ref[...].astype(hidden_dtype)     # (H, 1)
    b2 = b2_ref[0, 0]                         # f32 scalar from SMEM

    def chunk_body(c, carry):
        off = pl.multiple_of(c * lane_chunk, 128)
        x = x_ref[:, pl.ds(off, lane_chunk)].astype(hidden_dtype)   # (1, C)
        h = jnp.maximum(x * w1 + b1, 0.0)                           # (H, C)  VPU
        # fc2: VPU multiply, XLU sublane reduction over H with f32 accumulation,
        # then the scalar bias (kept in f32 regardless of hidden dtype).
        y = jnp.sum((h * w2).astype(jnp.float32), axis=0, keepdims=True) + b2
        o_ref[:, pl.ds(off, lane_chunk)] = y.astype(o_ref.dtype)
        return carry

    lax.fori_loop(0, n_chunks, chunk_body, 0, unroll=True)


def value_network_forward(state, w1, b1, w2, b2, *,
                          hidden_dtype=None, small_batch_threshold=512):
    """ValueNetwork forward: relu(state @ w1 + b1) @ w2 + b2.

    state: (B, 1) f32; w1: (1, H); b1: (1, H) or (H,); w2: (H, 1); b2: (1, 1) or scalar.
    Returns (B, 1) f32.
    """
    B = state.shape[0]
    H = w1.shape[-1]
    w1 = w1.reshape(1, H)
    b1 = b1.reshape(1, H)
    w2 = w2.reshape(H, 1)
    b2 = b2.reshape(1, 1)

    # Small-batch fast path: kernel launch + per-step overhead dominate at tiny B;
    # XLA fuses this trivially.  Set small_batch_threshold=0 to force the kernel.
    if B <= small_batch_threshold:
        return (jnp.maximum(state @ w1 + b1, 0.0) @ w2 + b2).astype(jnp.float32)

    if hidden_dtype is None:
        hidden_dtype = _default_hidden_dtype()

    # Layout plumbing only (free reshapes, no pad / no slice): batch on the lane
    # axis, weights as (H, 1) sublane columns, b2 as an SMEM scalar.
    x_row = state.astype(jnp.float32).reshape(1, B)
    w1_col = w1.astype(jnp.float32).reshape(H, 1)
    b1_col = b1.astype(jnp.float32).reshape(H, 1)
    w2_col = w2.astype(jnp.float32).reshape(H, 1)
    b2_s = b2.astype(jnp.float32).reshape(1, 1)

    tb, lane_chunk = _pick_batch_tile(B)
    n_chunks = tb // lane_chunk
    grid = (pl.cdiv(B, tb),)     # >=2 steps whenever B > tb -> both v7x TCs busy

    out = pl.pallas_call(
        functools.partial(_value_net_kernel, lane_chunk=lane_chunk,
                          n_chunks=n_chunks, hidden_dtype=hidden_dtype),
        out_shape=jax.ShapeDtypeStruct((1, B), jnp.float32),
        grid=grid,
        in_specs=[
            pl.BlockSpec((1, tb), lambda i: (0, i)),            # x slab (pipelined)
            pl.BlockSpec((H, 1), lambda i: (0, 0)),             # w1 (resident)
            pl.BlockSpec((H, 1), lambda i: (0, 0)),             # b1 (resident)
            pl.BlockSpec((H, 1), lambda i: (0, 0)),             # w2 (resident)
            pl.BlockSpec(memory_space=pltpu.MemorySpace.SMEM),  # b2 scalar in SMEM
        ],
        out_specs=pl.BlockSpec((1, tb), lambda i: (0, i)),
        compiler_params=pltpu.CompilerParams(
            dimension_semantics=("parallel",)),
    )(x_row, w1_col, b1_col, w2_col, b2_s)

    return out.reshape(B, 1)


def init_params(key, hidden_size=32):
    """Deterministic init mimicking PyTorch nn.Linear default (U[-1/sqrt(fan_in), 1/sqrt(fan_in)])."""
    k1, k2, k3, k4 = jax.random.split(key, 4)
    bound1 = 1.0 / jnp.sqrt(1.0)                  # fc1: fan_in = 1
    w1 = jax.random.uniform(k1, (1, hidden_size), jnp.float32, -bound1, bound1)
    b1 = jax.random.uniform(k2, (1, hidden_size), jnp.float32, -bound1, bound1)
    bound2 = 1.0 / jnp.sqrt(float(hidden_size))   # fc2: fan_in = hidden
    w2 = jax.random.uniform(k3, (hidden_size, 1), jnp.float32, -bound2, bound2)
    b2 = jax.random.uniform(k4, (1, 1), jnp.float32, -bound2, bound2)
    return w1, b1, w2, b2


def _reference(state, w1, b1, w2, b2):
    return jnp.maximum(state @ w1 + b1, 0.0) @ w2 + b2


if __name__ == "__main__":
    key = jax.random.PRNGKey(0)
    k_state, k_params, k_big, k_huge = jax.random.split(key, 4)

    H = 32
    w1, b1, w2, b2 = init_params(k_params, hidden_size=H)

    # 1) Small shape matching the module's typical use (B=8, hidden=32).
    #    Force the Pallas path with f32 hidden compute: exact-semantics check.
    B = 8
    state = jax.random.normal(k_state, (B, 1), jnp.float32)
    ref = _reference(state, w1, b1, w2, b2)
    out = jax.block_until_ready(
        value_network_forward(state, w1, b1, w2, b2,
                              hidden_dtype=jnp.float32,
                              small_batch_threshold=0))
    assert out.shape == (B, 1)
    assert jnp.allclose(out, ref, atol=1e-5, rtol=1e-5)

    # Default dispatch at this size takes the plain-jnp fast path; check it too.
    out_fast = jax.block_until_ready(value_network_forward(state, w1, b1, w2, b2))
    assert jnp.allclose(out_fast, ref, atol=1e-6, rtol=1e-6)

    # Tolerance for the auto hidden dtype (bf16 on v6e/v7x loses ~1e-2 of the
    # hidden-activation precision; accumulation stays f32).
    auto_dtype = _default_hidden_dtype()
    tol_a, tol_r = (5e-2, 5e-2) if auto_dtype == jnp.bfloat16 else (1e-5, 1e-5)

    # 2) Medium batch: single ragged block, multi-chunk inner loop, auto dtype.
    B2 = 5000
    state2 = jax.random.normal(k_big, (B2, 1), jnp.float32)
    out2 = jax.block_until_ready(value_network_forward(state2, w1, b1, w2, b2))
    ref2 = _reference(state2, w1, b1, w2, b2)
    assert out2.shape == (B2, 1)
    assert jnp.allclose(out2, ref2, atol=tol_a, rtol=tol_r)

    # 3) Larger batch: multi-step grid (>=2 steps -> both v7x TCs), ragged last
    #    block, no pad / no slice around the kernel.
    B3 = 70_000
    state3 = jax.random.normal(k_huge, (B3, 1), jnp.float32)
    out3 = jax.block_until_ready(value_network_forward(state3, w1, b1, w2, b2))
    ref3 = _reference(state3, w1, b1, w2, b2)
    assert out3.shape == (B3, 1)
    assert jnp.allclose(out3, ref3, atol=tol_a, rtol=tol_r)

    print("KERNEL_OK")
</pallas_src>

<mosaic_0001>
module attributes {stable_mosaic.version = 11 : i64} {
  func.func @_value_net_kernel(%arg0: i32, %arg1: memref<1x128xf32, #tpu.memory_space<vmem>>, %arg2: memref<32x1xf32, #tpu.memory_space<vmem>>, %arg3: memref<32x1xf32, #tpu.memory_space<vmem>>, %arg4: memref<32x1xf32, #tpu.memory_space<vmem>>, %arg5: memref<1x1xf32, #tpu.memory_space<smem>>, %arg6: memref<1x128xf32, #tpu.memory_space<vmem>>) attributes {dimension_semantics = [#tpu.dimension_semantics<parallel>], iteration_bounds = array<i64: 1>, scalar_prefetch = 0 : i64, scratch_operands = 0 : i64, tpu.core_type = #tpu.core_type<tc>, window_params = [{transform_indices = @transform_0, window_bounds = array<i64: 1, 128>}, {pipeline_mode = #tpu.pipeline_mode<synchronous>, transform_indices = @transform_1, window_bounds = array<i64: 32, 1>}, {pipeline_mode = #tpu.pipeline_mode<synchronous>, transform_indices = @transform_2, window_bounds = array<i64: 32, 1>}, {pipeline_mode = #tpu.pipeline_mode<synchronous>, transform_indices = @transform_3, window_bounds = array<i64: 32, 1>}, {transform_indices = @transform_4, window_bounds = array<i64: 1, 1>}, {transform_indices = @transform_5, window_bounds = array<i64: 1, 128>}]} {
    %c0 = arith.constant 0 : index
    %c0_0 = arith.constant 0 : index
    %0 = vector.load %arg2[%c0, %c0_0] : memref<32x1xf32, #tpu.memory_space<vmem>>, vector<32x1xf32>
    %c0_1 = arith.constant 0 : index
    %c0_2 = arith.constant 0 : index
    %1 = vector.load %arg3[%c0_1, %c0_2] : memref<32x1xf32, #tpu.memory_space<vmem>>, vector<32x1xf32>
    %c0_3 = arith.constant 0 : index
    %c0_4 = arith.constant 0 : index
    %2 = vector.load %arg4[%c0_3, %c0_4] : memref<32x1xf32, #tpu.memory_space<vmem>>, vector<32x1xf32>
    %c0_5 = arith.constant 0 : index
    %c0_6 = arith.constant 0 : index
    %3 = memref.load %arg5[%c0_5, %c0_6] : memref<1x1xf32, #tpu.memory_space<smem>>
    %c0_i32 = arith.constant 0 : i32
    %c128_i32 = arith.constant 128 : i32
    %4 = arith.muli %c0_i32, %c128_i32 : i32
    %5 = tpu.assume_multiple %4, 128 : i32
    %c0_7 = arith.constant 0 : index
    %6 = arith.index_cast %5 : i32 to index
    %7 = vector.load %arg1[%c0_7, %6] : memref<1x128xf32, #tpu.memory_space<vmem>>, vector<1x128xf32>
    %8 = vector.broadcast %7 : vector<1x128xf32> to vector<32x128xf32>
    %9 = vector.broadcast %0 : vector<32x1xf32> to vector<32x128xf32>
    %10 = arith.mulf %8, %9 : vector<32x128xf32>
    %11 = vector.broadcast %1 : vector<32x1xf32> to vector<32x128xf32>
    %12 = arith.addf %10, %11 : vector<32x128xf32>
    %cst = arith.constant 0.000000e+00 : f32
    %13 = vector.broadcast %cst : f32 to vector<32x128xf32>
    %14 = arith.maximumf %12, %13 : vector<32x128xf32>
    %15 = vector.broadcast %2 : vector<32x1xf32> to vector<32x128xf32>
    %16 = arith.mulf %14, %15 : vector<32x128xf32>
    %cst_8 = arith.constant dense<0.000000e+00> : vector<128xf32>
    %17 = vector.multi_reduction <add>, %16, %cst_8 [0] : vector<32x128xf32> to vector<128xf32>
    %18 = vector.shape_cast %17 : vector<128xf32> to vector<1x128xf32>
    %19 = vector.broadcast %3 : f32 to vector<1x128xf32>
    %20 = arith.addf %18, %19 : vector<1x128xf32>
    %c0_9 = arith.constant 0 : index
    %21 = arith.index_cast %5 : i32 to index
    %22 = vector.load %arg6[%c0_9, %21] : memref<1x128xf32, #tpu.memory_space<vmem>>, vector<1x128xf32>
    tpu.vector_store %arg6[%c0_9, %21], %20 {strides = array<i32>} : memref<1x128xf32, #tpu.memory_space<vmem>>, vector<1x128xf32>,
    %c1_i32 = arith.constant 1 : i32
    return
  }
  func.func @transform_0(%arg0: i32) -> (i32, i32) {
    %c0_i32 = arith.constant 0 : i32
    %c0_i32_0 = arith.constant 0 : i32
    return %c0_i32, %arg0 : i32, i32
  }
  func.func @transform_1(%arg0: i32) -> (i32, i32) {
    %c0_i32 = arith.constant 0 : i32
    %c0_i32_0 = arith.constant 0 : i32
    %c0_i32_1 = arith.constant 0 : i32
    return %c0_i32, %c0_i32_0 : i32, i32
  }
  func.func @transform_2(%arg0: i32) -> (i32, i32) {
    %c0_i32 = arith.constant 0 : i32
    %c0_i32_0 = arith.constant 0 : i32
    %c0_i32_1 = arith.constant 0 : i32
    return %c0_i32, %c0_i32_0 : i32, i32
  }
  func.func @transform_3(%arg0: i32) -> (i32, i32) {
    %c0_i32 = arith.constant 0 : i32
    %c0_i32_0 = arith.constant 0 : i32
    %c0_i32_1 = arith.constant 0 : i32
    return %c0_i32, %c0_i32_0 : i32, i32
  }
  func.func @transform_4(%arg0: i32) -> (i32, i32) {
    %c0_i32 = arith.constant 0 : i32
    %c0_i32_0 = arith.constant 0 : i32
    %c0_i32_1 = arith.constant 0 : i32
    return %c0_i32, %c0_i32_0 : i32, i32
  }
  func.func @transform_5(%arg0: i32) -> (i32, i32) {
    %c0_i32 = arith.constant 0 : i32
    %c0_i32_0 = arith.constant 0 : i32
    return %c0_i32, %arg0 : i32, i32
  }
}

</mosaic_0001>

<bundles_post_ra>
// kernel: tpu_custom_call.1
= control target key start
LH: loop header
LB: loop body
LE: loop exit
PB: predicated region body
PF: predicated region fallthrough
CT: control target
= control target key end

     0   :  { %v175_v2 = vmov 0   ;;  %s252_s0 = inlined_call_operand.vmem [shape: f32[1,8], index: 0, kind: input, shape index: {}]   ;;  %s253_s1 = inlined_call_operand.vmem [shape: f32[32,1], index: 1, kind: input, shape index: {}]   ;;  %s254_s2 = inlined_call_operand.vmem [shape: f32[32,1], index: 2, kind: input, shape index: {}]   ;;  %s255_s3 = inlined_call_operand.vmem [shape: f32[32,1], index: 3, kind: input, shape index: {}]   ;;  %s256_s4 = inlined_call_operand.<no memory space> [shape: f32[1,1], index: 4, kind: input, shape index: {}]   ;;  %s257_s5 = inlined_call_operand.hbm [shape: f32[1,8], index: 5, kind: output, shape index: {}]  }
   0x1   :  { %v24_v0 = vld [vmem:[%s253_s1 + $0x10] sm:$0xff]  ;;  %v22_v1 = vld [vmem:[%s253_s1] sm:$0xff]  ;;  %146 = vset.pattern.permute.xlu1 %v175_v2  ;;  %145 = vset.pattern.permute.xlu0 %v175_v2  ;;  %v27_v3 = vld [vmem:[%s254_s2 + $0x8] sm:$0xff] }
   0x2   :  { %51 = vperm.xlu1 %146, %v24_v0   ;;  %41 = vperm.xlu0 %145, %v22_v1  }
   0x3   :  { %147 = vset.pattern.permute.xlu2 %v175_v2 }
   0x4   :  { %70 = vperm.xlu2 %147, %v27_v3  }
   0x5   :  { %11 = vsyncpa [#allocation4], 0  ;;  %v26_v4 = vld [vmem:[%s254_s2] sm:$0xff]  ;;  %v23_v5 = vld [vmem:[%s253_s1 + $0x8] sm:$0xff]  ;;  %v124_v50 = vstv %s256_s4  ;;  %s176_s17 = smov [#allocation3]   ;;  %s134_s21 = sshll.u32 %s257_s5, 4  ;;  %s135_s21 = int_to_ptr.hbm [resolvable:$true] %s134_s21 }
   0x6   :  { %v25_v6 = vld [vmem:[%s253_s1 + $0x18] sm:$0xff]  ;;  %v28_v8 = vld [vmem:[%s254_s2 + $0x10] sm:$0xff]  ;;  %v30_v9 = vld [vmem:[%s255_s3] sm:$0xff]  ;;  %s132_s18 = sshll.u32 %s176_s17, 4  ;;  %s133_s18 = int_to_ptr.vmem [resolvable:$true] %s132_s18 }
   0x7   :  { %v29_v7 = vld [vmem:[%s254_s2 + $0x18] sm:$0xff]  ;;  %v32_v10 = vld [vmem:[%s255_s3 + $0x10] sm:$0xff]  ;;  %v31_v11 = vld [vmem:[%s255_s3 + $0x8] sm:$0xff] }
   0x8   :  { %v33_v12 = vld [vmem:[%s255_s3 + $0x18] sm:$0xff]  ;;  %v148_v19 = vld [vmem:[%s252_s0] ss:$0 sm:$0xff] }
   0xa   :  { %65 = vperm.xlu1 %146, %v26_v4   ;;  %46 = vperm.xlu0 %145, %v23_v5  }
   0xc   :  { %56 = vperm.xlu2 %147, %v25_v6  }
  0x12   :  { %80 = vperm.xlu1 %146, %v29_v7   ;;  %75 = vperm.xlu0 %145, %v28_v8  }
  0x14   :  { %93 = vperm.xlu2 %147, %v30_v9  }
  0x1a   :  { %103 = vperm.xlu1 %146, %v32_v10   ;;  %98 = vperm.xlu0 %145, %v31_v11  }
  0x1c   :  { %108 = vperm.xlu2 %147, %v33_v12  }
  0x5e   :  { %v71_v13 = vpop.permute.xlu2 %70 }
  0x66   :  { %v57_v16 = vpop.permute.xlu2 %56 }
  0x67   :  { %v62_v26 = vmul.f32 %v148_v19, %v57_v16 }
  0x6e   :  { %v94_v25 = vpop.permute.xlu2 %93 }
  0x74   :  { %v52_v14 = vpop.permute.xlu1 %51  ;;  %v42_v15 = vpop.permute.xlu0 %41 }
  0x75   :  { %v59_v20 = vmul.f32 %v148_v19, %v42_v15  ;;  %v61_v27 = vmul.f32 %v148_v19, %v52_v14 }
  0x76   :  { %v109_v41 = vpop.permute.xlu2 %108 }
  0x7c   :  { %v66_v17 = vpop.permute.xlu1 %65  ;;  %v47_v18 = vpop.permute.xlu0 %46 }
  0x7d   :  { %v60_v21 = vmul.f32 %v148_v19, %v47_v18  ;;  %v83_v24 = vadd.f32 %v66_v17, %v59_v20 }
  0x7f   :  { %v84_v28 = vadd.f32 %v71_v13, %v60_v21  ;;  %v87_v29 = vmax.f32 %v83_v24, 0.0 }
  0x81   :  { %v88_v32 = vmax.f32 %v84_v28, 0.0  ;;  %v111_v35 = vmul.f32 %v94_v25, %v87_v29 }
  0x84   :  { %v81_v22 = vpop.permute.xlu1 %80  ;;  %v76_v23 = vpop.permute.xlu0 %75 }
  0x85   :  { %v86_v30 = vadd.f32 %v81_v22, %v62_v26  ;;  %v85_v31 = vadd.f32 %v76_v23, %v61_v27 }
  0x87   :  { %v90_v36 = vmax.f32 %v86_v30, 0.0  ;;  %v89_v37 = vmax.f32 %v85_v31, 0.0 }
  0x89   :  { %v114_v42 = vmul.f32 %v109_v41, %v90_v36 }
  0x8c   :  { %v104_v33 = vpop.permute.xlu1 %103  ;;  %v99_v34 = vpop.permute.xlu0 %98 }
  0x8d   :  { %v112_v38 = vmul.f32 %v99_v34, %v88_v32  ;;  %v113_v39 = vmul.f32 %v104_v33, %v89_v37 }
  0x8f   :  { %v115_v40 = vadd.f32 %v112_v38, %v111_v35 }
  0x91   :  { %v116_v43 = vadd.f32 %v115_v40, %v113_v39 }
  0x93   :  { %v117_v44 = vadd.f32 %v116_v43, %v114_v42 }
  0x95   :  { %v118_v45 = vrot.slane %v117_v44, 4 }
  0x97   :  { %v119_v46 = vadd.f32 %v118_v45, %v117_v44 }
  0x99   :  { %v120_v47 = vrot.slane %v119_v46, 2 }
  0x9b   :  { %v121_v48 = vadd.f32 %v120_v47, %v119_v46 }
  0x9d   :  { %v122_v49 = vrot.slane %v121_v48, 1 }
  0x9f   :  { %v123_v51 = vadd.f32 %v122_v49, %v121_v48 }
  0xa1   :  { %v125_v52 = vadd.f32 %v124_v50, %v123_v51 }
  0xa3   :  { %126 = vst [vmem:[#allocation3] sm:$0x1] %v125_v52 }
  0xa4   :  { %137 = dma.vmem_to_hbm [thread:$0]  %s133_s18, 16, %s135_s21, [#allocation4]  }
  0xa5   :  { %173 = dma.done.wait [#allocation4], 16  }
  0xa6   :  { %174 = vsyncadd [#allocation4], 4294967280 }
  0xa7   :  { %142 = vsyncpa [#allocation4], 1 }

</bundles_post_ra>
